<compile_context>
chip_gen: v7x
topology: tpu7x:2x2x1
jax: 0.10.0
libtpu: 0.0.40
codegen_flags: <defaults>
</compile_context>

<pallas_src>
import functools

import jax
import jax.numpy as jnp
from jax.experimental import pallas as pl
from jax.experimental.pallas import tpu as pltpu

_LANES = 128  # TPU lane width; every kernel output last-dim is a multiple of it.


# ----------------------------------------------------------------------------
# Pallas kernels
# ----------------------------------------------------------------------------
def _matmul_kernel(a_ref, b_ref, o_ref):
    o_ref[...] = jnp.dot(a_ref[...], b_ref[...],
                         preferred_element_type=jnp.float32)


def _conv_matmul_bias_relu_kernel(a_ref, w_ref, b_ref, o_ref):
    acc = jnp.dot(a_ref[...], w_ref[...], preferred_element_type=jnp.float32)
    o_ref[...] = jnp.maximum(acc + b_ref[...], 0.0)


def _mean_pool_kernel(x_ref, o_ref):
    # x: (B, g, 128) -- pooling bins in the lane dim, bin members in sublanes.
    o_ref[...] = jnp.mean(x_ref[...], axis=1)


# ----------------------------------------------------------------------------
# Tiling helpers
# ----------------------------------------------------------------------------
def _round_up(x, m):
    return ((x + m - 1) // m) * m


def _tile_m(mp):
    """Pick an M tile (multiple of 8) giving >= 2 grid steps when possible."""
    for tm in (512, 256, 128, 64):
        if mp % tm == 0 and mp // tm >= 2:
            return tm
    return mp


# ----------------------------------------------------------------------------
# Pallas wrappers
# ----------------------------------------------------------------------------
def pallas_matmul(a, b):
    """(M, K) @ (K, N) -> (M, N) f32; M padded to a 128-multiple and tiled."""
    M, K = a.shape
    _, N = b.shape
    Mp = _round_up(M, 128)
    a = jnp.pad(a, ((0, Mp - M), (0, 0)))
    tm = _tile_m(Mp)
    out = pl.pallas_call(
        _matmul_kernel,
        out_shape=jax.ShapeDtypeStruct((Mp, N), jnp.float32),
        grid=(Mp // tm,),
        in_specs=[pl.BlockSpec((tm, K), lambda i: (i, 0)),
                  # constant index_map -> operand is DMA'd once, not per step.
                  pl.BlockSpec((K, N), lambda i: (0, 0))],
        out_specs=pl.BlockSpec((tm, N), lambda i: (i, 0)),
        compiler_params=pltpu.CompilerParams(
            dimension_semantics=("parallel",)),
    )(a, b)
    return out[:M]


def conv3x3_relu(x, w, b, stride):
    """3x3 conv (pad=1, given stride) + bias + ReLU. NHWC in/out.

    im2col is a transpose-free concat of 9 strided NHWC slices (cheap at
    stride 4/2, and no extra (0,2,1) relayout pass); the matmul + bias + ReLU
    run fused in one Pallas kernel whose output channel dim is padded to 128
    lanes so all stores are unmasked.
    # TODO(synk): a fully in-kernel halo-BlockSpec im2col (9 shifted dots on a
    # VMEM-resident tile) would further remove the cols write for stride-1.
    """
    B, H, W, C = x.shape
    Cout = w.shape[0]
    assert Cout <= _LANES
    OH = (H + 2 - 3) // stride + 1
    OW = (W + 2 - 3) // stride + 1
    xp = jnp.pad(x, ((0, 0), (1, 1), (1, 1), (0, 0)))
    cols = jnp.concatenate(
        [xp[:, ky:ky + (OH - 1) * stride + 1:stride,
               kx:kx + (OW - 1) * stride + 1:stride, :]
         for ky in range(3) for kx in range(3)], axis=-1)        # (B,OH,OW,9C)
    K = 9 * C
    cols = cols.reshape(B * OH * OW, K)

    # Weight to (ky, kx, cin) x cout ordering, lane-padded to 128 out channels.
    wm = jnp.transpose(w, (2, 3, 1, 0)).reshape(K, Cout)
    wm = jnp.pad(wm, ((0, 0), (0, _LANES - Cout)))
    bm = jnp.pad(b.reshape(1, Cout), ((0, 0), (0, _LANES - Cout)))

    M = cols.shape[0]
    Mp = _round_up(M, 128)
    cols = jnp.pad(cols, ((0, Mp - M), (0, 0)))
    tm = _tile_m(Mp)

    # NOTE: operands stay f32 for numerical fidelity with the PyTorch reference;
    # cast to bf16 (keeping preferred_element_type=f32) once real MXU-worthy
    # backbone shapes are used.  Weight/bias index_maps are constant so they are
    # fetched once; at real ResNet scale they could also be single-buffered.
    out = pl.pallas_call(
        _conv_matmul_bias_relu_kernel,
        out_shape=jax.ShapeDtypeStruct((Mp, _LANES), jnp.float32),
        grid=(Mp // tm,),
        in_specs=[pl.BlockSpec((tm, K), lambda i: (i, 0)),
                  pl.BlockSpec((K, _LANES), lambda i: (0, 0)),
                  pl.BlockSpec((1, _LANES), lambda i: (0, 0))],
        out_specs=pl.BlockSpec((tm, _LANES), lambda i: (i, 0)),
        compiler_params=pltpu.CompilerParams(
            dimension_semantics=("parallel",)),
    )(cols, wm, bm)
    out = out[:M, :Cout]
    return out.reshape(B, OH, OW, Cout)


def pallas_adaptive_avg_pool1d(flat, target_dim):
    """common.Aggregator: reshape(B,1,-1) -> adaptive_avg_pool1d(target_dim)."""
    B, L = flat.shape
    # TODO(synk): general uneven-bin adaptive_avg_pool1d not implemented; shapes
    # are chosen so L % target_dim == 0 and every bin is exactly L//target_dim.
    assert L % target_dim == 0, "choose shapes so adaptive bins are exact"
    assert target_dim % _LANES == 0
    g = L // target_dim
    # Lane-dense layout: bins (target_dim = 3x128) in the lane dim, the g bin
    # members in the sublane dim; reduce over sublanes, store (B,128) unmasked.
    x = jnp.swapaxes(flat.reshape(B, target_dim, g), 1, 2)      # (B, g, 384)
    return pl.pallas_call(
        _mean_pool_kernel,
        out_shape=jax.ShapeDtypeStruct((B, target_dim), jnp.float32),
        grid=(target_dim // _LANES,),
        in_specs=[pl.BlockSpec((B, g, _LANES), lambda t: (0, 0, t))],
        out_specs=pl.BlockSpec((B, _LANES), lambda t: (0, t)),
        compiler_params=pltpu.CompilerParams(
            dimension_semantics=("parallel",)),
    )(x)


# ----------------------------------------------------------------------------
# Plain-JAX glue (data movement / tiny index math only)
# ----------------------------------------------------------------------------
def patchify_nhwc(x):
    """PatchMaker(3, stride=1).patchify on an NHWC map -> (B, h*w, C, 3, 3)."""
    B, h, w, C = x.shape
    xp = jnp.pad(x, ((0, 0), (1, 1), (1, 1), (0, 0)))
    patches = jnp.stack([xp[:, ky:ky + h, kx:kx + w, :]
                         for ky in range(3) for kx in range(3)], axis=-1)
    # (B, h, w, C, 9) -> (B, h*w, C, 3, 3): same values/order as the PyTorch
    # Unfold + reshape + permute sequence.
    return patches.reshape(B, h * w, C, 3, 3), (h, w)


def _bilinear_matrix(out_size, in_size):
    """1D interp matrix matching F.interpolate(bilinear, align_corners=False)."""
    scale = in_size / out_size
    i = jnp.arange(out_size, dtype=jnp.float32)
    src = jnp.maximum((i + 0.5) * scale - 0.5, 0.0)
    i0 = jnp.clip(jnp.floor(src).astype(jnp.int32), 0, in_size - 1)
    i1 = jnp.minimum(i0 + 1, in_size - 1)
    w1 = src - i0.astype(jnp.float32)
    w0 = 1.0 - w1
    rows = jnp.arange(out_size)
    mat = jnp.zeros((out_size, in_size), jnp.float32)
    mat = mat.at[rows, i0].add(w0)
    mat = mat.at[rows, i1].add(w1)
    return mat


# ----------------------------------------------------------------------------
# PatchEmbedding.forward
# ----------------------------------------------------------------------------
def patch_embedding_forward(images, params, target_embed_dimension=384):
    B = images.shape[0]
    # NCHW -> NHWC once; all conv / patchify glue below is channels-last so the
    # im2col concat and patch stacking need no large relayout passes.
    x = jnp.transpose(images, (0, 2, 3, 1))

    # --- synthetic backbone feature pyramid (layer2-like, layer3-like) -------
    f2 = conv3x3_relu(x, params["w2"], params["b2"], stride=4)   # (B,H/4,W/4,C1)
    f3 = conv3x3_relu(f2, params["w3"], params["b3"], stride=2)  # (B,H/8,W/8,C2)
    feats = [f2, f3]

    # --- patch_maker.patchify (3x3, stride 1) --------------------------------
    patched = [patchify_nhwc(f) for f in feats]
    features = [p[0] for p in patched]            # (B, L_i, C_i, 3, 3)
    patch_shapes = [p[1] for p in patched]
    ref_h, ref_w = patch_shapes[0]

    # --- upsample deeper layers to the reference patch grid ------------------
    # F.interpolate(bilinear, align_corners=False) as ONE Pallas matmul: the two
    # separable 1D interp matrices are folded into a kron matrix and the big
    # B*C*9 axis is kept in the lane (last) dim of the kernel output.
    for i in range(1, len(features)):
        _f = features[i]
        ph, pw = patch_shapes[i]
        C = _f.shape[2]
        _f = _f.reshape(B, ph, pw, C, 3, 3)
        _f = jnp.transpose(_f, (0, 3, 4, 5, 1, 2))          # (B, C, 3, 3, ph, pw)
        n = B * C * 9
        xt = _f.reshape(n, ph * pw).T                       # (ph*pw, n)
        kmat = jnp.kron(_bilinear_matrix(ref_h, ph),
                        _bilinear_matrix(ref_w, pw))        # (rh*rw, ph*pw)
        yt = pallas_matmul(kmat, xt)                        # (rh*rw, n)
        y = jnp.transpose(yt.reshape(ref_h * ref_w, B, C, 3, 3),
                          (1, 0, 2, 3, 4))                  # (B, rh*rw, C, 3, 3)
        features[i] = y

    # --- exact replication of the (memory-reinterpreting) reshape + cat ------
    features = [f.reshape(B, f.shape[-3], -1) for f in features]
    features = jnp.concatenate(features, axis=1)

    # --- preadapt_aggregator (common.Aggregator, target_dim=384) -------------
    flat = features.reshape(B, -1)
    return pallas_adaptive_avg_pool1d(flat, target_embed_dimension)


# ----------------------------------------------------------------------------
if __name__ == "__main__":
    key = jax.random.PRNGKey(0)
    k_img, k_w2, k_b2, k_w3, k_b3 = jax.random.split(key, 5)

    # Small shapes consistent with the module: NCHW images, two-layer pyramid.
    B, Cin, H, W = 2, 3, 32, 32
    C1, C2 = 8, 16

    images = jax.random.normal(k_img, (B, Cin, H, W), jnp.float32)
    params = {
        "w2": jax.random.normal(k_w2, (C1, Cin, 3, 3), jnp.float32) * 0.1,
        "b2": jax.random.normal(k_b2, (C1,), jnp.float32) * 0.1,
        "w3": jax.random.normal(k_w3, (C2, C1, 3, 3), jnp.float32) * 0.1,
        "b3": jax.random.normal(k_b3, (C2,), jnp.float32) * 0.1,
    }

    fwd = jax.jit(functools.partial(patch_embedding_forward,
                                    target_embed_dimension=384))
    out = fwd(images, params)
    out = jax.block_until_ready(out)
    assert out.shape == (B, 384), out.shape
    assert out.dtype == jnp.float32
    print("KERNEL_OK")
</pallas_src>

<mosaic_0001>
module attributes {stable_mosaic.version = 11 : i64} {
  func.func @_conv_matmul_bias_relu_kernel(%arg0: i32, %arg1: memref<64x27xf32, #tpu.memory_space<vmem>>, %arg2: memref<27x128xf32, #tpu.memory_space<vmem>>, %arg3: memref<1x128xf32, #tpu.memory_space<vmem>>, %arg4: memref<64x128xf32, #tpu.memory_space<vmem>>) attributes {dimension_semantics = [#tpu.dimension_semantics<parallel>], iteration_bounds = array<i64: 2>, scalar_prefetch = 0 : i64, scratch_operands = 0 : i64, tpu.core_type = #tpu.core_type<tc>, window_params = [{transform_indices = @transform_0, window_bounds = array<i64: 64, 27>}, {pipeline_mode = #tpu.pipeline_mode<synchronous>, transform_indices = @transform_1, window_bounds = array<i64: 27, 128>}, {pipeline_mode = #tpu.pipeline_mode<synchronous>, transform_indices = @transform_2, window_bounds = array<i64: 1, 128>}, {transform_indices = @transform_3, window_bounds = array<i64: 64, 128>}]} {
    %c0 = arith.constant 0 : index
    %c0_0 = arith.constant 0 : index
    %0 = vector.load %arg1[%c0, %c0_0] : memref<64x27xf32, #tpu.memory_space<vmem>>, vector<64x27xf32>
    %c0_1 = arith.constant 0 : index
    %c0_2 = arith.constant 0 : index
    %1 = vector.load %arg2[%c0_1, %c0_2] : memref<27x128xf32, #tpu.memory_space<vmem>>, vector<27x128xf32>
    %cst = arith.constant dense<0.000000e+00> : vector<64x128xf32>
    %2 = tpu.matmul %0, %1, %cst {dimension_numbers = #tpu.dot_dimension_numbers<[1], [0], [0], [1], [0, 0, 1, 1], [], []>} : vector<64x27xf32>, vector<27x128xf32>, vector<64x128xf32> -> vector<64x128xf32>
    %c0_3 = arith.constant 0 : index
    %c0_4 = arith.constant 0 : index
    %3 = vector.load %arg3[%c0_3, %c0_4] : memref<1x128xf32, #tpu.memory_space<vmem>>, vector<1x128xf32>
    %4 = vector.broadcast %3 : vector<1x128xf32> to vector<64x128xf32>
    %5 = arith.addf %2, %4 : vector<64x128xf32>
    %cst_5 = arith.constant 0.000000e+00 : f32
    %6 = vector.broadcast %cst_5 : f32 to vector<64x128xf32>
    %7 = arith.maximumf %5, %6 : vector<64x128xf32>
    %c0_6 = arith.constant 0 : index
    %c0_7 = arith.constant 0 : index
    %8 = vector.load %arg4[%c0_6, %c0_7] : memref<64x128xf32, #tpu.memory_space<vmem>>, vector<64x128xf32>
    tpu.vector_store %arg4[%c0_6, %c0_7], %7 {strides = array<i32>} : memref<64x128xf32, #tpu.memory_space<vmem>>, vector<64x128xf32>,
    return
  }
  func.func @transform_0(%arg0: i32) -> (i32, i32) {
    %c0_i32 = arith.constant 0 : i32
    %c0_i32_0 = arith.constant 0 : i32
    return %arg0, %c0_i32 : i32, i32
  }
  func.func @transform_1(%arg0: i32) -> (i32, i32) {
    %c0_i32 = arith.constant 0 : i32
    %c0_i32_0 = arith.constant 0 : i32
    %c0_i32_1 = arith.constant 0 : i32
    return %c0_i32, %c0_i32_0 : i32, i32
  }
  func.func @transform_2(%arg0: i32) -> (i32, i32) {
    %c0_i32 = arith.constant 0 : i32
    %c0_i32_0 = arith.constant 0 : i32
    %c0_i32_1 = arith.constant 0 : i32
    return %c0_i32, %c0_i32_0 : i32, i32
  }
  func.func @transform_3(%arg0: i32) -> (i32, i32) {
    %c0_i32 = arith.constant 0 : i32
    %c0_i32_0 = arith.constant 0 : i32
    return %arg0, %c0_i32 : i32, i32
  }
}

module attributes {stable_mosaic.version = 11 : i64} {
  func.func @_conv_matmul_bias_relu_kernel(%arg0: i32, %arg1: memref<64x72xf32, #tpu.memory_space<vmem>>, %arg2: memref<72x128xf32, #tpu.memory_space<vmem>>, %arg3: memref<1x128xf32, #tpu.memory_space<vmem>>, %arg4: memref<64x128xf32, #tpu.memory_space<vmem>>) attributes {dimension_semantics = [#tpu.dimension_semantics<parallel>], iteration_bounds = array<i64: 2>, scalar_prefetch = 0 : i64, scratch_operands = 0 : i64, tpu.core_type = #tpu.core_type<tc>, window_params = [{transform_indices = @transform_0, window_bounds = array<i64: 64, 72>}, {pipeline_mode = #tpu.pipeline_mode<synchronous>, transform_indices = @transform_1, window_bounds = array<i64: 72, 128>}, {pipeline_mode = #tpu.pipeline_mode<synchronous>, transform_indices = @transform_2, window_bounds = array<i64: 1, 128>}, {transform_indices = @transform_3, window_bounds = array<i64: 64, 128>}]} {
    %c0 = arith.constant 0 : index
    %c0_0 = arith.constant 0 : index
    %0 = vector.load %arg1[%c0, %c0_0] : memref<64x72xf32, #tpu.memory_space<vmem>>, vector<64x72xf32>
    %c0_1 = arith.constant 0 : index
    %c0_2 = arith.constant 0 : index
    %1 = vector.load %arg2[%c0_1, %c0_2] : memref<72x128xf32, #tpu.memory_space<vmem>>, vector<72x128xf32>
    %cst = arith.constant dense<0.000000e+00> : vector<64x128xf32>
    %2 = tpu.matmul %0, %1, %cst {dimension_numbers = #tpu.dot_dimension_numbers<[1], [0], [0], [1], [0, 0, 1, 1], [], []>} : vector<64x72xf32>, vector<72x128xf32>, vector<64x128xf32> -> vector<64x128xf32>
    %c0_3 = arith.constant 0 : index
    %c0_4 = arith.constant 0 : index
    %3 = vector.load %arg3[%c0_3, %c0_4] : memref<1x128xf32, #tpu.memory_space<vmem>>, vector<1x128xf32>
    %4 = vector.broadcast %3 : vector<1x128xf32> to vector<64x128xf32>
    %5 = arith.addf %2, %4 : vector<64x128xf32>
    %cst_5 = arith.constant 0.000000e+00 : f32
    %6 = vector.broadcast %cst_5 : f32 to vector<64x128xf32>
    %7 = arith.maximumf %5, %6 : vector<64x128xf32>
    %c0_6 = arith.constant 0 : index
    %c0_7 = arith.constant 0 : index
    %8 = vector.load %arg4[%c0_6, %c0_7] : memref<64x128xf32, #tpu.memory_space<vmem>>, vector<64x128xf32>
    tpu.vector_store %arg4[%c0_6, %c0_7], %7 {strides = array<i32>} : memref<64x128xf32, #tpu.memory_space<vmem>>, vector<64x128xf32>,
    return
  }
  func.func @transform_0(%arg0: i32) -> (i32, i32) {
    %c0_i32 = arith.constant 0 : i32
    %c0_i32_0 = arith.constant 0 : i32
    return %arg0, %c0_i32 : i32, i32
  }
  func.func @transform_1(%arg0: i32) -> (i32, i32) {
    %c0_i32 = arith.constant 0 : i32
    %c0_i32_0 = arith.constant 0 : i32
    %c0_i32_1 = arith.constant 0 : i32
    return %c0_i32, %c0_i32_0 : i32, i32
  }
  func.func @transform_2(%arg0: i32) -> (i32, i32) {
    %c0_i32 = arith.constant 0 : i32
    %c0_i32_0 = arith.constant 0 : i32
    %c0_i32_1 = arith.constant 0 : i32
    return %c0_i32, %c0_i32_0 : i32, i32
  }
  func.func @transform_3(%arg0: i32) -> (i32, i32) {
    %c0_i32 = arith.constant 0 : i32
    %c0_i32_0 = arith.constant 0 : i32
    return %arg0, %c0_i32 : i32, i32
  }
}

module attributes {stable_mosaic.version = 11 : i64} {
  func.func @_matmul_kernel(%arg0: i32, %arg1: memref<64x16xf32, #tpu.memory_space<vmem>>, %arg2: memref<16x288xf32, #tpu.memory_space<vmem>>, %arg3: memref<64x288xf32, #tpu.memory_space<vmem>>) attributes {dimension_semantics = [#tpu.dimension_semantics<parallel>], iteration_bounds = array<i64: 2>, scalar_prefetch = 0 : i64, scratch_operands = 0 : i64, tpu.core_type = #tpu.core_type<tc>, window_params = [{transform_indices = @transform_0, window_bounds = array<i64: 64, 16>}, {pipeline_mode = #tpu.pipeline_mode<synchronous>, transform_indices = @transform_1, window_bounds = array<i64: 16, 288>}, {transform_indices = @transform_2, window_bounds = array<i64: 64, 288>}]} {
    %c0 = arith.constant 0 : index
    %c0_0 = arith.constant 0 : index
    %0 = vector.load %arg1[%c0, %c0_0] : memref<64x16xf32, #tpu.memory_space<vmem>>, vector<64x16xf32>
    %c0_1 = arith.constant 0 : index
    %c0_2 = arith.constant 0 : index
    %1 = vector.load %arg2[%c0_1, %c0_2] : memref<16x288xf32, #tpu.memory_space<vmem>>, vector<16x288xf32>
    %cst = arith.constant dense<0.000000e+00> : vector<64x288xf32>
    %2 = tpu.matmul %0, %1, %cst {dimension_numbers = #tpu.dot_dimension_numbers<[1], [0], [0], [1], [0, 0, 1, 1], [], []>} : vector<64x16xf32>, vector<16x288xf32>, vector<64x288xf32> -> vector<64x288xf32>
    %c0_3 = arith.constant 0 : index
    %c0_4 = arith.constant 0 : index
    %3 = vector.load %arg3[%c0_3, %c0_4] : memref<64x288xf32, #tpu.memory_space<vmem>>, vector<64x288xf32>
    tpu.vector_store %arg3[%c0_3, %c0_4], %2 {strides = array<i32>} : memref<64x288xf32, #tpu.memory_space<vmem>>, vector<64x288xf32>,
    return
  }
  func.func @transform_0(%arg0: i32) -> (i32, i32) {
    %c0_i32 = arith.constant 0 : i32
    %c0_i32_0 = arith.constant 0 : i32
    return %arg0, %c0_i32 : i32, i32
  }
  func.func @transform_1(%arg0: i32) -> (i32, i32) {
    %c0_i32 = arith.constant 0 : i32
    %c0_i32_0 = arith.constant 0 : i32
    %c0_i32_1 = arith.constant 0 : i32
    return %c0_i32, %c0_i32_0 : i32, i32
  }
  func.func @transform_2(%arg0: i32) -> (i32, i32) {
    %c0_i32 = arith.constant 0 : i32
    %c0_i32_0 = arith.constant 0 : i32
    return %arg0, %c0_i32 : i32, i32
  }
}

module attributes {stable_mosaic.version = 11 : i64} {
  func.func @_mean_pool_kernel(%arg0: i32, %arg1: memref<2x36x128xf32, #tpu.memory_space<vmem>>, %arg2: memref<2x128xf32, #tpu.memory_space<vmem>>) attributes {dimension_semantics = [#tpu.dimension_semantics<parallel>], iteration_bounds = array<i64: 3>, scalar_prefetch = 0 : i64, scratch_operands = 0 : i64, tpu.core_type = #tpu.core_type<tc>, window_params = [{transform_indices = @transform_0, window_bounds = array<i64: 2, 36, 128>}, {transform_indices = @transform_1, window_bounds = array<i64: 2, 128>}]} {
    %c0 = arith.constant 0 : index
    %c0_0 = arith.constant 0 : index
    %c0_1 = arith.constant 0 : index
    %0 = vector.load %arg1[%c0, %c0_0, %c0_1] : memref<2x36x128xf32, #tpu.memory_space<vmem>>, vector<2x36x128xf32>
    %cst = arith.constant dense<0.000000e+00> : vector<2x128xf32>
    %1 = vector.multi_reduction <add>, %0, %cst [1] : vector<2x36x128xf32> to vector<2x128xf32>
    %cst_2 = arith.constant 3.600000e+01 : f32
    %2 = vector.broadcast %cst_2 : f32 to vector<2x128xf32>
    %3 = arith.divf %1, %2 : vector<2x128xf32>
    %c0_3 = arith.constant 0 : index
    %c0_4 = arith.constant 0 : index
    %4 = vector.load %arg2[%c0_3, %c0_4] : memref<2x128xf32, #tpu.memory_space<vmem>>, vector<2x128xf32>
    tpu.vector_store %arg2[%c0_3, %c0_4], %3 {strides = array<i32>} : memref<2x128xf32, #tpu.memory_space<vmem>>, vector<2x128xf32>,
    return
  }
  func.func @transform_0(%arg0: i32) -> (i32, i32, i32) {
    %c0_i32 = arith.constant 0 : i32
    %c0_i32_0 = arith.constant 0 : i32
    %c0_i32_1 = arith.constant 0 : i32
    return %c0_i32, %c0_i32_0, %arg0 : i32, i32, i32
  }
  func.func @transform_1(%arg0: i32) -> (i32, i32) {
    %c0_i32 = arith.constant 0 : i32
    %c0_i32_0 = arith.constant 0 : i32
    return %c0_i32, %arg0 : i32, i32
  }
}

</mosaic_0001>

<bundles_post_ra>
// kernel: patch_embedding_forward.4
= control target key start
LH: loop header
LB: loop body
LE: loop exit
PB: predicated region body
PF: predicated region fallthrough
CT: control target
= control target key end

     0   :  { %s504_s12 = smov 0   ;;  %s547_s0 = inlined_call_operand.vmem [shape: f32[128,27], index: 0, kind: input, shape index: {}]   ;;  %s548_s1 = inlined_call_operand.vmem [shape: f32[27,128], index: 1, kind: input, shape index: {}]   ;;  %s549_s2 = inlined_call_operand.vmem [shape: f32[1,128], index: 2, kind: input, shape index: {}]   ;;  %s550_s3 = inlined_call_operand.vmem [shape: f32[128,128], index: 3, kind: output, shape index: {}]  }
   0x1 LB: > { %s399_s13 = sadd.s32 4294967295, %s481_s12   ;;  %p403_p0 = scmp.ge.s32.totalorder %s481_s12, 1  ;;  %s481_s12 = sphi %s504_s12, %s13_s12  }
   0x2   : > { %p138_p1 = scmp.lt.s32.totalorder %s481_s12, 3 }
   0x4   : > { %p139_p2 = pnand %p403_p0, %p138_p1 }
   0x5   : > { %v182_v0 = vld [vmem:[%s548_s1] sm:$0xff] (!%p139_p2)  ;;  %v183_v1 = vld [vmem:[%s548_s1 + $0x8] sm:$0xff] (!%p139_p2)  ;;  %v184_v2 = vld [vmem:[%s548_s1 + $0x10] sm:$0xff] (!%p139_p2)  ;;  %vm218_vm0 = vcmask (!%p139_p2), 1042432   ;;  %s404_s20 = sshll.u32 (!%p139_p2), %s399_s13, 3  ;;  %vm483_vm1 = vmmov (!%p139_p2), 1  }
   0x6   : > { %142 = sbr.rel (%p139_p2) target bundleno = 241 (0xf1), region = 32  ;;  %v452_v3 = vpack.c.bf16 (!%p139_p2), %v183_v1, %v182_v0  ;;  %v185_v4 = vld [vmem:[%s548_s1 + $0x18] sm:$0x7] (!%p139_p2)  ;;  %p163_p3 = scmp.lt.s32.totalorder (!%p139_p2), %s404_s20, 15  ;;  %vm457_vm2 = vmpackc.low (!%p139_p2), %vm218_vm0, %vm483_vm1  ;;  %vm193_vm3 = vcmask (!%p139_p2), 220160  }
   0x7   : > { %v456_v5 = vpack.c.bf16 (!%p139_p2), %v185_v4, %v184_v2  ;;  %v408_v14 = vld [vmem:[%s549_s2] ss:$0 sm:$0xff] (!%p139_p2) }
   0x8   : > { %453 = vmatprep.subr.bf16.mxu0 (!%p139_p2), %v452_v3  ;;  %462 = vmatprep.subr.bf16.mxu1 (!%p139_p2), %v452_v3 }
   0x9   : > { %455 = vmatpush3.bf16.msra.mxu0 (!%p139_p2), %v452_v3  ;;  %464 = vmatpush3.bf16.msra.mxu1 (!%p139_p2), %v452_v3 }
   0xa   : > { %458 = vmatprep.subr.msk.bf16.mxu0 (!%p139_p2), %vm457_vm2, %v456_v5  ;;  %463 = vmatprep.subr.msk.bf16.mxu1 (!%p139_p2), %vm457_vm2, %v456_v5 }
   0xd   : > { %s552_s20 = smov (!%p163_p3, %s404_s20), 15  ;;  %461 = vmatpush3.bf16.msk.msra.mxu0 %vm457_vm2, %v456_v5  ;;  %465 = vmatpush3.bf16.msk.msra.mxu1 %vm457_vm2, %v456_v5 }
   0xe   : > { %s405_s23 = sshll.u32 %s552_s20, 3 }
   0xf   : > { %s166_s26 = scalar_lea.vmem %s547_s0, %s405_s23  ;;  %s172_s4 = scalar_lea.vmem %s550_s3, %s405_s23 }
  0x10   : > { %v174_v6 = vld [vmem:[%s166_s26] sm:$0xff]  ;;  %v175_v8 = vld [vmem:[%s166_s26 + $0x8] sm:$0xff]  ;;  %v176_v10 = vld [vmem:[%s166_s26 + $0x10] sm:$0xff] }
  0x11   : > { %v178_v7 = vld [vmem:[%s166_s26 + $0x20] sm:$0xff]  ;;  %v179_v9 = vld [vmem:[%s166_s26 + $0x28] sm:$0xff]  ;;  %440 = vmatprep.mubr.msk.f32.mxu0 %vm193_vm3, %v174_v6  ;;  %v180_v11 = vld [vmem:[%s166_s26 + $0x30] sm:$0xff] }
  0x12   : > { %446 = vmatprep.mubr.msk.f32.mxu1 %vm193_vm3, %v178_v7  ;;  %441 = vmatmul.mubr.msk.f32.vlgmr.msra.gmra.mrb[0].mxu0 %vm193_vm3, %v175_v8  ;;  %v177_v12 = vld [vmem:[%s166_s26 + $0x18] sm:$0xff] }
  0x13   : > { %447 = vmatmul.mubr.msk.f32.vlgmr.msra.gmra.mrb[0].mxu1 %vm193_vm3, %v179_v9  ;;  %443 = vmatprep.mubr.msk.f32.mxu0 %vm193_vm3, %v176_v10  ;;  %v181_v13 = vld [vmem:[%s166_s26 + $0x38] sm:$0xff] }
  0x14   : > { %449 = vmatprep.mubr.msk.f32.mxu1 %vm193_vm3, %v180_v11 }
  0x16   : > { %444 = vmatmul.mubr.msk.f32.gmra.mrb[2].mxu0 %vm193_vm3, %v177_v12 }
  0x17   : > { %450 = vmatmul.mubr.msk.f32.gmra.mrb[2].mxu1 %vm193_vm3, %v181_v13 }
  0xe5   : > { %v442_v15 = vpop.f32.mrb[0].mxu0 }
  0xe6   : > { %v448_v16 = vpop.f32.mrb[0].mxu1  ;;  %v294_v17 = vadd.f32 %v442_v15, %v408_v14  ;;  %v288_v19 = vpop.f32.mrb[1].mxu0 }
  0xe7   : > { %v314_v18 = vadd.f32 %v448_v16, %v408_v14  ;;  %v308_v20 = vpop.f32.mrb[1].mxu1  ;;  %v289_v21 = vadd.f32 %v408_v14, %v288_v19 }
  0xe8   : > { %v309_v22 = vadd.f32 %v408_v14, %v308_v20  ;;  %v328_v23 = vmax.f32 %v294_v17, 0.0 }
  0xe9   : > { %v332_v24 = vmax.f32 %v314_v18, 0.0  ;;  %v327_v25 = vmax.f32 %v289_v21, 0.0  ;;  %v445_v27 = vpop.f32.mrb[2].mxu0 }
  0xea   : > { %v331_v26 = vmax.f32 %v309_v22, 0.0  ;;  %v451_v28 = vpop.f32.mrb[2].mxu1  ;;  %336 = vst [vmem:[%s172_s4 + $0x8] sm:$0xff] %v328_v23  ;;  %v304_v29 = vadd.f32 %v445_v27, %v408_v14  ;;  %v298_v31 = vpop.f32.mrb[3].mxu0 }
  0xeb   : > { %340 = vst [vmem:[%s172_s4 + $0x28] sm:$0xff] %v332_v24  ;;  %v324_v30 = vadd.f32 %v451_v28, %v408_v14  ;;  %v318_v32 = vpop.f32.mrb[3].mxu1  ;;  %335 = vst [vmem:[%s172_s4] sm:$0xff] %v327_v25  ;;  %v299_v33 = vadd.f32 %v408_v14, %v298_v31 }
  0xec   : > { %339 = vst [vmem:[%s172_s4 + $0x20] sm:$0xff] %v331_v26  ;;  %v319_v34 = vadd.f32 %v408_v14, %v318_v32  ;;  %v330_v35 = vmax.f32 %v304_v29, 0.0 }
  0xed   : > { %v334_v36 = vmax.f32 %v324_v30, 0.0  ;;  %v329_v37 = vmax.f32 %v299_v33, 0.0 }
  0xee   : > { %v333_v38 = vmax.f32 %v319_v34, 0.0  ;;  %338 = vst [vmem:[%s172_s4 + $0x18] sm:$0xff] %v330_v35 }
  0xef   : > { %342 = vst [vmem:[%s172_s4 + $0x38] sm:$0xff] %v334_v36  ;;  %337 = vst [vmem:[%s172_s4 + $0x10] sm:$0xff] %v329_v37 }
  0xf0   : > { %341 = vst [vmem:[%s172_s4 + $0x30] sm:$0xff] %v333_v38 }
  0xf1 PF: > { %s13_s12 = sadd.s32 1, %s481_s12  }
  0xf2   : > { %p10_p4 = scmp.ge.s32.totalorder %s13_s12, 4  }
  0xf4   :  { %12 = sbr.rel (!%p10_p4) target bundleno = 1 (0x1), region = 62 }

// kernel: patch_embedding_forward.5
= control target key start
LH: loop header
LB: loop body
LE: loop exit
PB: predicated region body
PF: predicated region fallthrough
CT: control target
= control target key end

     0   :  { %s529_s12 = smov 0   ;;  %s601_s0 = inlined_call_operand.vmem [shape: f32[128,72], index: 0, kind: input, shape index: {}]   ;;  %s602_s1 = inlined_call_operand.vmem [shape: f32[72,128], index: 1, kind: input, shape index: {}]   ;;  %s603_s2 = inlined_call_operand.vmem [shape: f32[1,128], index: 2, kind: input, shape index: {}]   ;;  %s604_s3 = inlined_call_operand.vmem [shape: f32[128,128], index: 3, kind: output, shape index: {}]  }
   0x1 LB: > { %s400_s13 = sadd.s32 4294967295, %s507_s12   ;;  %p404_p0 = scmp.ge.s32.totalorder %s507_s12, 1  ;;  %s507_s12 = sphi %s529_s12, %s13_s12  }
   0x2   : > { %p138_p1 = scmp.lt.s32.totalorder %s507_s12, 3 }
   0x4   : > { %p139_p2 = pnand %p404_p0, %p138_p1 }
   0x5   : > { %v182_v0 = vld [vmem:[%s602_s1] sm:$0xff] (!%p139_p2)  ;;  %v183_v1 = vld [vmem:[%s602_s1 + $0x8] sm:$0xff] (!%p139_p2)  ;;  %v184_v2 = vld [vmem:[%s602_s1 + $0x10] sm:$0xff] (!%p139_p2)  ;;  %s405_s20 = sshll.u32 (!%p139_p2), %s400_s13, 3  ;;  %vm198_vm0 = vcmask (!%p139_p2), 588800  }
   0x6   : > { %142 = sbr.rel (%p139_p2) target bundleno = 249 (0xf9), region = 32  ;;  %v467_v3 = vpack.c.bf16 (!%p139_p2), %v183_v1, %v182_v0  ;;  %v185_v4 = vld [vmem:[%s602_s1 + $0x18] sm:$0xff] (!%p139_p2)  ;;  %p163_p3 = scmp.lt.s32.totalorder (!%p139_p2), %s405_s20, 15  ;;  %v186_v6 = vld [vmem:[%s602_s1 + $0x20] sm:$0xff] (!%p139_p2)  ;;  %v187_v7 = vld [vmem:[%s602_s1 + $0x28] sm:$0xff] (!%p139_p2) }
   0x7   : > { %v471_v5 = vpack.c.bf16 (!%p139_p2), %v185_v4, %v184_v2  ;;  %v475_v8 = vpack.c.bf16 (!%p139_p2), %v187_v7, %v186_v6  ;;  %v188_v9 = vld [vmem:[%s602_s1 + $0x30] sm:$0xff] (!%p139_p2)  ;;  %v189_v10 = vld [vmem:[%s602_s1 + $0x38] sm:$0xff] (!%p139_p2)  ;;  %v190_v14 = vld [vmem:[%s602_s1 + $0x40] sm:$0xff] (!%p139_p2) }
   0x8   : > { %468 = vmatprep.subr.bf16.mxu0 (!%p139_p2), %v467_v3  ;;  %483 = vmatprep.subr.bf16.mxu1 (!%p139_p2), %v467_v3  ;;  %v479_v13 = vpack.c.bf16 (!%p139_p2), %v189_v10, %v188_v9  ;;  %v409_v21 = vld [vmem:[%s603_s2] ss:$0 sm:$0xff] (!%p139_p2) }
   0x9   : > { %470 = vmatpush3.bf16.msra.mxu0 (!%p139_p2), %v467_v3  ;;  %488 = vmatpush3.bf16.msra.mxu1 (!%p139_p2), %v467_v3 }
   0xa   : > { %472 = vmatprep.subr.bf16.mxu0 (!%p139_p2), %v471_v5  ;;  %484 = vmatprep.subr.bf16.mxu1 (!%p139_p2), %v471_v5 }
   0xd   : > { %s606_s20 = smov (!%p163_p3, %s405_s20), 15  ;;  %474 = vmatpush3.bf16.msra.mxu0 %v471_v5  ;;  %489 = vmatpush3.bf16.msra.mxu1 %v471_v5 }
   0xe   : > { %s406_s27 = sshll.u32 %s606_s20, 3  ;;  %476 = vmatprep.subr.bf16.mxu0 %v475_v8  ;;  %485 = vmatprep.subr.bf16.mxu1 %v475_v8 }
   0xf   : > { %s569_s7 = scalar_lea.vmem %s601_s0, %s406_s27  ;;  %s172_s15 = scalar_lea.vmem %s604_s3, %s406_s27 }
  0x10   : > { %v174_v11 = vld [vmem:[%s569_s7] sm:$0xff]  ;;  %v175_v15 = vld [vmem:[%s569_s7 + $0x8] sm:$0xff]  ;;  %v176_v17 = vld [vmem:[%s569_s7 + $0x10] sm:$0xff] }
  0x11   : > { %v178_v12 = vld [vmem:[%s569_s7 + $0x20] sm:$0xff]  ;;  %455 = vmatprep.mubr.msk.f32.mxu0 %vm198_vm0, %v174_v11  ;;  %478 = vmatpush3.bf16.msra.mxu0 %v475_v8  ;;  %v179_v16 = vld [vmem:[%s569_s7 + $0x28] sm:$0xff]  ;;  %v180_v18 = vld [vmem:[%s569_s7 + $0x30] sm:$0xff] }
  0x12   : > { %461 = vmatprep.mubr.msk.f32.mxu1 %vm198_vm0, %v178_v12  ;;  %490 = vmatpush3.bf16.msra.mxu1 %v475_v8  ;;  %v177_v19 = vld [vmem:[%s569_s7 + $0x18] sm:$0xff] }
  0x13   : > { %480 = vmatprep.subr.bf16.mxu0 %v479_v13  ;;  %486 = vmatprep.subr.bf16.mxu1 %v479_v13  ;;  %v181_v20 = vld [vmem:[%s569_s7 + $0x38] sm:$0xff] }
  0x15   : > { %482 = vmatpush3.bf16.msra.mxu0 %v479_v13 }
  0x16   : > { %491 = vmatpush3.bf16.msra.mxu1 %v479_v13  ;;  %453 = vmatprep.subr.mxu0 %v190_v14 }
  0x17   : > { %487 = vmatprep.subr.mxu1 %v190_v14 }
  0x19   : > { %454 = vmatpush3.msra.mxu0 %v190_v14 }
  0x1a   : > { %492 = vmatpush3.msra.mxu1 %v190_v14  ;;  %456 = vmatmul.mubr.msk.f32.vlgmr.msra.gmra.mrb[0].mxu0 %vm198_vm0, %v175_v15 }
  0x1b   : > { %462 = vmatmul.mubr.msk.f32.vlgmr.msra.gmra.mrb[0].mxu1 %vm198_vm0, %v179_v16  ;;  %458 = vmatprep.mubr.msk.f32.mxu0 %vm198_vm0, %v176_v17 }
  0x1c   : > { %464 = vmatprep.mubr.msk.f32.mxu1 %vm198_vm0, %v180_v18 }
  0x1e   : > { %459 = vmatmul.mubr.msk.f32.gmra.mrb[2].mxu0 %vm198_vm0, %v177_v19 }
  0x1f   : > { %465 = vmatmul.mubr.msk.f32.gmra.mrb[2].mxu1 %vm198_vm0, %v181_v20 }
  0xed   : > { %v457_v22 = vpop.f32.mrb[0].mxu0 }
  0xee   : > { %v463_v23 = vpop.f32.mrb[0].mxu1  ;;  %v295_v24 = vadd.f32 %v457_v22, %v409_v21  ;;  %v289_v26 = vpop.f32.mrb[1].mxu0 }
  0xef   : > { %v315_v25 = vadd.f32 %v463_v23, %v409_v21  ;;  %v309_v27 = vpop.f32.mrb[1].mxu1  ;;  %v290_v28 = vadd.f32 %v409_v21, %v289_v26 }
  0xf0   : > { %v310_v29 = vadd.f32 %v409_v21, %v309_v27  ;;  %v329_v30 = vmax.f32 %v295_v24, 0.0 }
  0xf1   : > { %v333_v31 = vmax.f32 %v315_v25, 0.0  ;;  %v328_v32 = vmax.f32 %v290_v28, 0.0  ;;  %v460_v34 = vpop.f32.mrb[2].mxu0 }
  0xf2   : > { %v332_v33 = vmax.f32 %v310_v29, 0.0  ;;  %v466_v35 = vpop.f32.mrb[2].mxu1  ;;  %337 = vst [vmem:[%s172_s15 + $0x8] sm:$0xff] %v329_v30  ;;  %v305_v36 = vadd.f32 %v460_v34, %v409_v21  ;;  %v299_v38 = vpop.f32.mrb[3].mxu0 }
  0xf3   : > { %341 = vst [vmem:[%s172_s15 + $0x28] sm:$0xff] %v333_v31  ;;  %v325_v37 = vadd.f32 %v466_v35, %v409_v21  ;;  %v319_v39 = vpop.f32.mrb[3].mxu1  ;;  %336 = vst [vmem:[%s172_s15] sm:$0xff] %v328_v32  ;;  %v300_v40 = vadd.f32 %v409_v21, %v299_v38 }
  0xf4   : > { %340 = vst [vmem:[%s172_s15 + $0x20] sm:$0xff] %v332_v33  ;;  %v320_v41 = vadd.f32 %v409_v21, %v319_v39  ;;  %v331_v42 = vmax.f32 %v305_v36, 0.0 }
  0xf5   : > { %v335_v43 = vmax.f32 %v325_v37, 0.0  ;;  %v330_v44 = vmax.f32 %v300_v40, 0.0 }
  0xf6   : > { %v334_v45 = vmax.f32 %v320_v41, 0.0  ;;  %339 = vst [vmem:[%s172_s15 + $0x18] sm:$0xff] %v331_v42 }
  0xf7   : > { %343 = vst [vmem:[%s172_s15 + $0x38] sm:$0xff] %v335_v43  ;;  %338 = vst [vmem:[%s172_s15 + $0x10] sm:$0xff] %v330_v44 }
  0xf8   : > { %342 = vst [vmem:[%s172_s15 + $0x30] sm:$0xff] %v334_v45 }
  0xf9 PF: > { %s13_s12 = sadd.s32 1, %s507_s12  }
  0xfa   : > { %p10_p4 = scmp.ge.s32.totalorder %s13_s12, 4  }
  0xfc   :  { %12 = sbr.rel (!%p10_p4) target bundleno = 1 (0x1), region = 62 }

// kernel: patch_embedding_forward.6
= control target key start
LH: loop header
LB: loop body
LE: loop exit
PB: predicated region body
PF: predicated region fallthrough
CT: control target
= control target key end

     0   :  { %s586_s9 = smov 0   ;;  %s675_s0 = inlined_call_operand.vmem [shape: f32[128,16], index: 0, kind: input, shape index: {}]   ;;  %s676_s1 = inlined_call_operand.vmem [shape: f32[16,288], index: 1, kind: input, shape index: {}]   ;;  %s677_s2 = inlined_call_operand.vmem [shape: f32[128,288], index: 2, kind: output, shape index: {}]  }
   0x1 LB: > { %s489_s10 = sadd.s32 4294967295, %s568_s9   ;;  %p493_p0 = scmp.ge.s32.totalorder %s568_s9, 1  ;;  %s568_s9 = sphi %s586_s9, %s12_s9  }
   0x2   : > { %p113_p1 = scmp.lt.s32.totalorder %s568_s9, 3 }
   0x4   : > { %p114_p2 = pnand %p493_p0, %p113_p1 }
   0x5   : > { %v158_v0 = vld [vmem:[%s676_s1 + $0x8] sm:$0xff] (!%p114_p2)  ;;  %v161_v1 = vld [vmem:[%s676_s1 + $0x20] sm:$0xff] (!%p114_p2)  ;;  %s494_s17 = sshll.u32 (!%p114_p2), %s489_s10, 3  ;;  %v160_v4 = vld [vmem:[%s676_s1 + $0x18] sm:$0xff] (!%p114_p2)  ;;  %v570_v5 = vmov (!%p114_p2), 0.0   ;;  %vm163_vm0 = vcmask (!%p114_p2), 130048  }
   0x6   : > { %117 = sbr.rel (%p114_p2) target bundleno = 251 (0xfb), region = 28  ;;  %v157_v2 = vld [vmem:[%s676_s1] sm:$0xff] (!%p114_p2)  ;;  %v542_v3 = vpack.c.bf16 (!%p114_p2), %v161_v1, %v158_v0  ;;  %252 = vmatprep.mubr.f32.mxu0 (!%p114_p2), %v570_v5  ;;  %288 = vmatprep.mubr.f32.mxu1 (!%p114_p2), %v570_v5  ;;  %v159_v6 = vld [vmem:[%s676_s1 + $0x10] sm:$0xff] (!%p114_p2)  ;;  %v162_v7 = vld [vmem:[%s676_s1 + $0x28] sm:$0xff] (!%p114_p2)  ;;  %p137_p3 = scmp.lt.s32.totalorder (!%p114_p2), %s494_s17, 15  ;;  %vm408_vm1 = vcmask (!%p114_p2), 261120  }
   0x7   : > { %v544_v8 = vpack.c.bf16 (!%p114_p2), %v160_v4, %v157_v2  ;;  %v546_v9 = vpack.c.bf16 (!%p114_p2), %v162_v7, %v159_v6 }
   0x8   : > { %550 = vmatprep.subr.bf16.mxu1 (!%p114_p2), %v542_v3  ;;  %543 = vmatprep.subr.bf16.mxu0 (!%p114_p2), %v542_v3 }
   0x9   : > { %551 = vmatpush1.bf16.msra.mxu1 (!%p114_p2), %v544_v8  ;;  %545 = vmatpush1.bf16.msra.mxu0 (!%p114_p2), %v544_v8 }
   0xa   : > { %547 = vmatprep.subr.bf16.mxu1 (!%p114_p2), %v546_v9 }
   0xd   : > { %s679_s17 = smov (!%p137_p3, %s494_s17), 15 }
   0xe   : > { %s495_s24 = sshll.u32 %s679_s17, 3  ;;  %s552_s28 = smul.u32 24, %s679_s17 }
   0xf   : > { %s140_s27 = scalar_lea.vmem %s675_s0, %s495_s24 }
  0x10   : > { %v149_v10 = vld [vmem:[%s140_s27] sm:$0xff]  ;;  %v155_v11 = vld [vmem:[%s140_s27 + $0x30] sm:$0xff]  ;;  %v150_v12 = vld [vmem:[%s140_s27 + $0x8] sm:$0xff]  ;;  %s638_s3 = scalar_lea.vmem %s677_s2, %s552_s28 }
  0x11   : > { %498 = vmatmul.mubr.msk.f32.vlgmr.msra.gmra.mrb[0].mxu0 %vm163_vm0, %v149_v10  ;;  %504 = vmatmul.mubr.msk.f32.vlgmr.msra.gmra.mrb[0].mxu1 %vm163_vm0, %v155_v11  ;;  %v156_v13 = vld [vmem:[%s140_s27 + $0x38] sm:$0xff]  ;;  %v151_v14 = vld [vmem:[%s140_s27 + $0x10] sm:$0xff]  ;;  %v153_v16 = vld [vmem:[%s140_s27 + $0x20] sm:$0xff] }
  0x12   : > { %549 = vmatpush3.bf16.msra.mxu1 %v546_v9  ;;  %258 = vmatprep.mubr.f32.mxu0 %v570_v5  ;;  %v152_v15 = vld [vmem:[%s140_s27 + $0x18] sm:$0xff]  ;;  %v154_v17 = vld [vmem:[%s140_s27 + $0x28] sm:$0xff] }
  0x13   : > { %294 = vmatprep.mubr.f32.mxu1 %v570_v5 }
  0x15   : > { %499 = vmatmul.mubr.msk.f32.gmra.mrb[2].mxu0 %vm163_vm0, %v150_v12  ;;  %505 = vmatmul.mubr.msk.f32.gmra.mrb[2].mxu1 %vm163_vm0, %v156_v13 }
  0x16   : > { %264 = vmatprep.mubr.f32.mxu0 %v570_v5  ;;  %530 = vmatprep.mubr.msk.f32.mxu1 %vm163_vm0, %v149_v10 }
  0x19   : > { %500 = vmatmul.mubr.msk.f32.gmra.mrb[4].mxu0 %vm163_vm0, %v151_v14  ;;  %531 = vmatmul.mubr.msk.f32.vlgmr.msra.gmra.mrb[4].mxu1 %vm163_vm0, %v150_v12 }
  0x1a   : > { %270 = vmatprep.mubr.f32.mxu0 %v570_v5  ;;  %533 = vmatprep.mubr.msk.f32.mxu1 %vm163_vm0, %v151_v14 }
  0x1d   : > { %501 = vmatmul.mubr.msk.f32.gmra.mrb[6].mxu0 %vm163_vm0, %v152_v15  ;;  %534 = vmatmul.mubr.msk.f32.gmra.mrb[6].mxu1 %vm163_vm0, %v152_v15 }
  0x1e   : > { %276 = vmatprep.mubr.f32.mxu0 %v570_v5  ;;  %536 = vmatprep.mubr.msk.f32.mxu1 %vm163_vm0, %v153_v16 }
  0x21   : > { %502 = vmatmul.mubr.msk.f32.gmra.mrb[8].mxu0 %vm163_vm0, %v153_v16  ;;  %537 = vmatmul.mubr.msk.f32.gmra.mrb[8].mxu1 %vm163_vm0, %v154_v17 }
  0x22   : > { %282 = vmatprep.mubr.f32.mxu0 %v570_v5  ;;  %539 = vmatprep.mubr.msk.f32.mxu1 %vm163_vm0, %v155_v11 }
  0x25   : > { %503 = vmatmul.mubr.msk.f32.gmra.mrb[10].mxu0 %vm163_vm0, %v154_v17  ;;  %540 = vmatmul.mubr.msk.f32.gmra.mrb[10].mxu1 %vm163_vm0, %v156_v13 }
  0xe4   : > { %v254_v18 = vpop.f32.mrb[0].mxu0  ;;  %v290_v19 = vpop.f32.mrb[0].mxu1 }
  0xe5   : > { %406 = vst [vmem:[%s638_s3] sm:$0xff] %v254_v18  ;;  %425 = vst [vmem:[%s638_s3 + $0x90] sm:$0xff] %v290_v19  ;;  %v256_v20 = vpop.f32.mrb[1].mxu0  ;;  %v292_v21 = vpop.f32.mrb[1].mxu1 }
  0xe6   : > { %407 = vst [vmem:[%s638_s3 + $0x8] sm:$0xff] %v256_v20  ;;  %426 = vst [vmem:[%s638_s3 + $0x98] sm:$0xff] %v292_v21 }
  0xe8   : > { %v260_v22 = vpop.f32.mrb[2].mxu0  ;;  %v296_v23 = vpop.f32.mrb[2].mxu1 }
  0xe9   : > { %410 = vst [vmem:[%s638_s3 + $0x18] sm:$0xff] %v260_v22  ;;  %428 = vst [vmem:[%s638_s3 + $0xa8] sm:$0xff] %v296_v23  ;;  %v262_v24 = vpop.f32.mrb[3].mxu0  ;;  %v298_v25 = vpop.f32.mrb[3].mxu1 }
  0xea   : > { %411 = vst [vmem:[%s638_s3 + $0x20] sm:$0xff] %v262_v24  ;;  %429 = vst [vmem:[%s638_s3 + $0xb0] sm:$0xff] %v298_v25 }
  0xec   : > { %v266_v26 = vpop.f32.mrb[4].mxu0  ;;  %v532_v27 = vpop.f32.mrb[4].mxu1 }
  0xed   : > { %413 = vst [vmem:[%s638_s3 + $0x30] sm:$0xff] %v266_v26  ;;  %412 = vst.msk [vmem:[%s638_s3 + $0x28] sm:$0xff] %vm408_vm1, %v532_v27  ;;  %v268_v28 = vpop.f32.mrb[5].mxu0  ;;  %v367_v29 = vpop.f32.mrb[5].mxu1 }
  0xee   : > { %414 = vst [vmem:[%s638_s3 + $0x38] sm:$0xff] %v268_v28  ;;  %409 = vst.msk [vmem:[%s638_s3 + $0x10] sm:$0xff] %vm408_vm1, %v367_v29 }
  0xf0   : > { %v272_v30 = vpop.f32.mrb[6].mxu0  ;;  %v535_v31 = vpop.f32.mrb[6].mxu1 }
  0xf1   : > { %416 = vst [vmem:[%s638_s3 + $0x48] sm:$0xff] %v272_v30  ;;  %418 = vst.msk [vmem:[%s638_s3 + $0x58] sm:$0xff] %vm408_vm1, %v535_v31  ;;  %v274_v32 = vpop.f32.mrb[7].mxu0  ;;  %v377_v33 = vpop.f32.mrb[7].mxu1 }
  0xf2   : > { %417 = vst [vmem:[%s638_s3 + $0x50] sm:$0xff] %v274_v32  ;;  %415 = vst.msk [vmem:[%s638_s3 + $0x40] sm:$0xff] %vm408_vm1, %v377_v33 }
  0xf4   : > { %v278_v34 = vpop.f32.mrb[8].mxu0  ;;  %v538_v35 = vpop.f32.mrb[8].mxu1 }
  0xf5   : > { %419 = vst [vmem:[%s638_s3 + $0x60] sm:$0xff] %v278_v34  ;;  %424 = vst.msk [vmem:[%s638_s3 + $0x88] sm:$0xff] %vm408_vm1, %v538_v35  ;;  %v280_v36 = vpop.f32.mrb[9].mxu0  ;;  %v387_v37 = vpop.f32.mrb[9].mxu1 }
  0xf6   : > { %420 = vst [vmem:[%s638_s3 + $0x68] sm:$0xff] %v280_v36  ;;  %421 = vst.msk [vmem:[%s638_s3 + $0x70] sm:$0xff] %vm408_vm1, %v387_v37 }
  0xf8   : > { %v284_v38 = vpop.f32.mrb[10].mxu0  ;;  %v541_v39 = vpop.f32.mrb[10].mxu1 }
  0xf9   : > { %422 = vst [vmem:[%s638_s3 + $0x78] sm:$0xff] %v284_v38  ;;  %430 = vst.msk [vmem:[%s638_s3 + $0xb8] sm:$0xff] %vm408_vm1, %v541_v39  ;;  %v286_v40 = vpop.f32.mrb[11].mxu0  ;;  %v397_v41 = vpop.f32.mrb[11].mxu1 }
  0xfa   : > { %423 = vst [vmem:[%s638_s3 + $0x80] sm:$0xff] %v286_v40  ;;  %427 = vst.msk [vmem:[%s638_s3 + $0xa0] sm:$0xff] %vm408_vm1, %v397_v41 }
  0xfb PF: > { %s12_s9 = sadd.s32 1, %s568_s9  }
  0xfc   : > { %p9_p4 = scmp.ge.s32.totalorder %s12_s9, 4  }
  0xfe   :  { %11 = sbr.rel (!%p9_p4) target bundleno = 1 (0x1), region = 58 }

// kernel: patch_embedding_forward.7
= control target key start
LH: loop header
LB: loop body
LE: loop exit
PB: predicated region body
PF: predicated region fallthrough
CT: control target
= control target key end

     0   :  { %6 = vsyncpa [#allocation4], 0  ;;  %s539_s0 = inlined_call_operand.vmem [shape: f32[2,36,384], index: 0, kind: input, shape index: {}]   ;;  %s540_s1 = inlined_call_operand.hbm [shape: f32[2,384], index: 1, kind: output, shape index: {}]  }
   0x1   :  { %8 = vsyncpa [#allocation4 + $0x1], 0  ;;  %s432_s6 = smov 0   ;;  %s434_s7 = smov 0  }
   0x2   :  { %s436_s8 = smov 0   ;;  %s438_s9 = smov 0  }
   0x3 LB: > { %s305_s10 = sadd.s32 4294967295, %s419_s9   ;;  %s306_s11 = sadd.s32 4294967294, %s419_s9   ;;  %s419_s9 = sphi %s438_s9, %s546_s9   ;;  %s415_s8 = sphi %s436_s8, %s545_s8   ;;  %s411_s7 = sphi %s434_s7, %s544_s7   ;;  %s407_s6 = sphi %s432_s6, %s543_s6  }
   0x4   : > { %s455_s12 = sadd.s32 1, %s419_s9   ;;  %s21_s13 = sadd.s32 1, %s415_s8 }
   0x5   : > { %s18_s14 = ssub.s32 %s419_s9, %s455_s12  ;;  %p28_p0 = scmp.ne.s32.totalorder %s415_s8, %s411_s7 }
   0x6   : > { %p19_p1 = scmp.eq.s32.totalorder %s18_s14, 0  ;;  %p29_p2 = scmp.eq.s32.totalorder %s419_s9, 0 }
   0x7   : > { %p58_p3 = scmp.eq.s32.totalorder %s305_s10, 2  ;;  %p63_p4 = scmp.ne.s32.totalorder %s411_s7, %s407_s6 }
   0x8   : > { %s468_s15 = scalar_select %p19_p1, %s415_s8, %s21_s13  }
   0x9   : > { %p30_p5 = por %p29_p2, %p28_p0  ;;  %p470_p6 = por %p58_p3, %p28_p0 }
   0xa   : > { %p64_p7 = scmp.eq.s32.totalorder %s306_s11, 2  ;;  %p308_p9 = scmp.ge.s32.totalorder %s419_s9, 3 }
   0xc   : > { %p474_p8 = por %p64_p7, %p63_p4  ;;  %80 = sbr.rel (%p308_p9) target bundleno = 29 (0x1d), region = 16 }
  0x13   : > { %83 = sbr.rel (!%p30_p5) target bundleno = 29 (0x1d), region = 20  ;;  %s85_s18 = sand.u32 (%p30_p5), 1, %s415_s8  }
  0x14   : > { %s309_s19 = sshll.u32 (%p30_p5), %s419_s9, 3  ;;  %s316_s20 = smul.u32 (%p30_p5), 80, %s85_s18 }
  0x15   : > { %s89_s23 = scalar_lea.vmem (%p30_p5), %s539_s0, %s309_s19 }
  0x16   : > { %v135_v0 = vld [vmem:[%s89_s23] sm:$0xff] (%p30_p5)  ;;  %v137_v1 = vld [vmem:[%s89_s23 + $0x18] sm:$0xff] (%p30_p5)  ;;  %v139_v2 = vld [vmem:[%s89_s23 + $0x30] sm:$0xff] (%p30_p5)  ;;  %s87_s24 = scalar_lea.vmem (%p30_p5), [#allocation2], %s316_s20 }
  0x17   : > { %v141_v3 = vld [vmem:[%s89_s23 + $0x48] sm:$0xff] (%p30_p5)  ;;  %v143_v4 = vld [vmem:[%s89_s23 + $0x60] sm:$0xff] (%p30_p5)  ;;  %v145_v5 = vld [vmem:[%s89_s23 + $0x78] sm:$0xff] (%p30_p5)  ;;  %136 = vst [vmem:[%s87_s24] sm:$0xff] (%p30_p5), %v135_v0 }
  0x18   : > { %138 = vst [vmem:[%s87_s24 + $0x8] sm:$0xff] (%p30_p5), %v137_v1  ;;  %140 = vst [vmem:[%s87_s24 + $0x10] sm:$0xff] (%p30_p5), %v139_v2  ;;  %v147_v6 = vld [vmem:[%s89_s23 + $0x90] sm:$0xff] (%p30_p5)  ;;  %v149_v7 = vld [vmem:[%s89_s23 + $0xa8] sm:$0xff] (%p30_p5) }
  0x19   : > { %142 = vst [vmem:[%s87_s24 + $0x18] sm:$0xff] (%p30_p5), %v141_v3  ;;  %144 = vst [vmem:[%s87_s24 + $0x20] sm:$0xff] (%p30_p5), %v143_v4  ;;  %v151_v8 = vld [vmem:[%s89_s23 + $0xc0] sm:$0xff] (%p30_p5)  ;;  %v153_v9 = vld [vmem:[%s89_s23 + $0xd8] sm:$0xff] (%p30_p5) }
  0x1a   : > { %146 = vst [vmem:[%s87_s24 + $0x28] sm:$0xff] %v145_v5  ;;  %148 = vst [vmem:[%s87_s24 + $0x30] sm:$0xff] %v147_v6 }
  0x1b   : > { %150 = vst [vmem:[%s87_s24 + $0x38] sm:$0xff] %v149_v7  ;;  %152 = vst [vmem:[%s87_s24 + $0x40] sm:$0xff] %v151_v8 }
  0x1c   : > { %154 = vst [vmem:[%s87_s24 + $0x48] sm:$0xff] %v153_v9 }
  0x1d PF: > { %p310_p10 = scmp.ge.s32.totalorder %s419_s9, 1  ;;  %p159_p11 = scmp.lt.s32.totalorder %s419_s9, 4 }
  0x1f   : > { %p160_p12 = pnand %p310_p10, %p159_p11 }
  0x20   : > { %s487_s25 = sand.u32 (!%p160_p12), 1, %s411_s7   ;;  %vm198_vm0 = vcmask (!%p160_p12), 1043456   ;;  %s313_s2 = sshll.u32 (!%p160_p12), %s305_s10, 5  ;;  %vm223_vm1 = vcmask (!%p160_p12), 1041409  }
  0x21   : > { %163 = sbr.rel (%p160_p12) target bundleno = 77 (0x4d), region = 58  ;;  %s311_s28 = sshll.u32 (!%p160_p12), %s487_s25, 1 }
  0x22   : > { %s317_s26 = smul.u32 (!%p160_p12), 80, %s487_s25  ;;  %s184_s29 = scalar_lea.vmem (!%p160_p12), [#allocation3], %s311_s28 }
  0x23   : > { %s241_s30 = sshll.u32 (!%p160_p12), %s184_s29, 4  ;;  %s498_s5 = scalar_lea.hbm (!%p160_p12), %s540_s1, %s313_s2  ;;  %s493_s30 = int_to_ptr.vmem [resolvable:$true] %s241_s30 }
  0x24   : > { %s168_s27 = scalar_lea.vmem (!%p160_p12), [#allocation2], %s317_s26  ;;  %s228_s11 = scalar_lea.sflag (!%p160_p12), [#allocation4], %s487_s25 }
  0x25   : > { %v185_v10 = vld [vmem:[%s168_s27] sm:$0xff] (!%p160_p12)  ;;  %v186_v11 = vld [vmem:[%s168_s27 + $0x8] sm:$0xff] (!%p160_p12)  ;;  %v187_v12 = vld [vmem:[%s168_s27 + $0x10] sm:$0xff] (!%p160_p12)  ;;  %s357_s13 = scalar_lea.vmem (!%p160_p12), %s493_s30, 32  ;;  %s421_s10 = smov (!%p160_p12), [#allocation3]  }
  0x26   : > { %v189_v13 = vld [vmem:[%s168_s27 + $0x20] sm:$0xf] (!%p160_p12)  ;;  %v190_v14 = vld [vmem:[%s168_s27 + $0x28] sm:$0xff] (!%p160_p12)  ;;  %v195_v15 = vadd.f32 (!%p160_p12), %v186_v11, %v185_v10  ;;  %v188_v16 = vld [vmem:[%s168_s27 + $0x18] sm:$0xff] (!%p160_p12)  ;;  %p358_p13 = scmp.ne.s32.totalorder (!%p160_p12), %s493_s30, %s357_s13  ;;  %s361_s14 = sshll.u32 (!%p160_p12), %s421_s10, 4  ;;  %s362_s14 = int_to_ptr.vmem [resolvable:$false] %s361_s14 }
  0x27   : > { %v191_v17 = vld [vmem:[%s168_s27 + $0x30] sm:$0xff] (!%p160_p12)  ;;  %v192_v18 = vld [vmem:[%s168_s27 + $0x38] sm:$0xff] (!%p160_p12)  ;;  %v194_v19 = vld [vmem:[%s168_s27 + $0x48] sm:$0xf] (!%p160_p12)  ;;  %v199_v23 = vsel (!%p160_p12), %vm198_vm0, %v189_v13, 0.0  ;;  %s363_s18 = scalar_lea.vmem (!%p160_p12), %s362_s14, 64  ;;  %p364_p2 = scmp.lt.s32.totalorder (!%p160_p12), %s493_s30, %s362_s14 }
  0x28   : > { %v196_v20 = vadd.f32 %v195_v15, %v187_v12  ;;  %v207_v21 = vadd.f32 %v191_v17, %v190_v14  ;;  %v193_v22 = vld [vmem:[%s168_s27 + $0x40] sm:$0xff]  ;;  %v210_v26 = vsel %vm198_vm0, %v194_v19, 0.0  ;;  %p359_p0 = pnand %p358_p13, %p470_p6  ;;  %p365_p3 = scmp.lt.s32.totalorder %s363_s18, %s357_s13 }
  0x2a   : > { %v197_v24 = vadd.f32 %v196_v20, %v188_v16  ;;  %v208_v25 = vadd.f32 %v207_v21, %v192_v18  ;;  %p360_p1 = pneg %p359_p0  ;;  %p366_p4 = por %p365_p3, %p364_p2 }
  0x2c   : > { %v200_v27 = vadd.f32 %v199_v23, %v197_v24  ;;  %v209_v28 = vadd.f32 %v208_v25, %v193_v22  ;;  %p367_p5 = pnand %p366_p4, %p360_p1 }
  0x2e   : > { %v201_v29 = vrot.slane %v200_v27, 4  ;;  %v211_v30 = vadd.f32 %v210_v26, %v209_v28 }
  0x30   : > { %v202_v31 = vadd.f32 %v201_v29, %v200_v27  ;;  %v212_v32 = vrot.slane %v211_v30, 4 }
  0x32   : > { %v203_v33 = vrot.slane %v202_v31, 2  ;;  %v213_v34 = vadd.f32 %v212_v32, %v211_v30 }
  0x34   : > { %v204_v35 = vadd.f32 %v203_v33, %v202_v31  ;;  %v214_v36 = vrot.slane %v213_v34, 2 }
  0x36   : > { %v205_v37 = vrot.slane %v204_v35, 1  ;;  %v215_v38 = vadd.f32 %v214_v36, %v213_v34 }
  0x38   : > { %v206_v39 = vadd.f32 %v205_v37, %v204_v35  ;;  %v216_v40 = vrot.slane %v215_v38, 1 }
  0x3a   : > { %v217_v41 = vadd.f32 %v216_v40, %v215_v38  ;;  %v219_v42 = vmul.f32 0.027777778, %v206_v39 }
  0x3c   : > { %v220_v43 = vmul.f32 0.027777778, %v217_v41 }
  0x3e   : > { %v224_v44 = vsel %vm223_vm1, %v220_v43, %v219_v42 }
  0x3f   : > { %226 = vst [vmem:[%s184_s29] sm:$0x3] %v224_v44 }
  0x40   : > { %370 = shalt.err (!%p367_p5)
}
  0x41   : > { %s371_s19 = scalar_lea.hbm %s498_s5, 32  ;;  %s375_s22 = scalar_lea.hbm %s540_s1, 96 }
  0x42   : > { %p372_p7 = scmp.ne.s32.totalorder %s498_s5, %s371_s19  ;;  %p376_p11 = scmp.lt.u32.totalorder %s498_s5, %s540_s1 }
  0x43   : > { %p377_p12 = scmp.lt.u32.totalorder %s375_s22, %s371_s19  ;;  %p379_p0 = scmp.lt.u32.totalorder %s371_s19, %s498_s5 }
  0x44   : > { %p373_p9 = pnand %p372_p7, %p470_p6 }
  0x45   : > { %p378_p13 = por %p377_p12, %p376_p11 }
  0x46   : > { %p374_p10 = pneg %p373_p9 }
  0x47   : > { %p380_p1 = por %p379_p0, %p378_p13 }
  0x49   : > { %p381_p2 = pnand %p380_p1, %p374_p10 }
  0x4b   : > { %384 = shalt.err (!%p381_p2)
}
  0x4c   : > { %318 = dma.vmem_to_hbm [thread:$0]  (%p470_p6), %s493_s30, 32, %s498_s5, %s228_s11  }
  0x4d PF: > { %p324_p3 = scmp.ge.s32.totalorder %s419_s9, 2  ;;  %s253_s25 = sand.u32 1, %s407_s6  }
  0x4e   : > { %s254_s26 = scalar_lea.sflag [#allocation4], %s253_s25 }
  0x4f   : > { %p321_p4 = pnand %p324_p3, %p474_p8 }
  0x51   : > { %402 = dma.done.wait (!%p321_p4), %s254_s26, 32  }
  0x52   : > { %404 = vsyncadd (!%p321_p4), %s254_s26, 4294967264  ;;  %p11_p5 = scmp.ge.s32.totalorder %s455_s12, 5   ;;  %s543_s6 = smov %s411_s7 }
  0x53   : > { %s544_s7 = smov %s415_s8  ;;  %s545_s8 = smov %s468_s15 }
  0x54   : > { %s546_s9 = smov %s455_s12  ;;  %13 = sbr.rel (!%p11_p5) target bundleno = 3 (0x3), region = 102 }
  0x5b   :  { %259 = vsyncpa [#allocation4], 1 }
  0x5c   :  { %261 = vsyncpa [#allocation4 + $0x1], 1 }

</bundles_post_ra>
